<compile_context>
chip_gen: v7x
topology: tpu7x:2x2x1
jax: 0.10.0
libtpu: 0.0.40
codegen_flags: <defaults>
</compile_context>

<pallas_src>
import functools
import math

import jax
import jax.numpy as jnp
from jax.experimental import pallas as pl
from jax.experimental.pallas import tpu as pltpu

_LANE = 128
_MAX_TILE_E = 2048  # edges per grid step (lane axis); VMEM cost per step is < 1 MiB


def _round_up(x, m):
    return ((x + m - 1) // m) * m


def _pick_tile(n_edges):
    """Edge-tile width. Big enough to amortize per-step overhead, small enough
    to keep >= 4 grid steps (v7x megacore sharding) when the problem allows."""
    n128 = _round_up(n_edges, _LANE)
    tile = min(_MAX_TILE_E, n128)
    if n128 >= 4 * _LANE:
        tile = min(tile, max(_LANE, (n128 // 4) // _LANE * _LANE))
    return tile


def _adjacency_kernel(a_ref, b_ref, links_ref, out_ref, *, K):
    # a_ref / b_ref tiles: (2K+2, T) packed as
    #   rows [0:K)      pos_mean   (endpoint A / B)
    #   rows [K:2K)     pos_var
    #   row  2K         het_mean
    #   row  2K+1       het_var
    a = a_ref[...].astype(jnp.float32)
    b = b_ref[...].astype(jnp.float32)

    ma, va = a[0:K, :], a[K:2 * K, :]
    mb, vb = b[0:K, :], b[K:2 * K, :]
    hma, hva = a[2 * K:2 * K + 1, :], a[2 * K + 1:2 * K + 2, :]
    hmb, hvb = b[2 * K:2 * K + 1, :], b[2 * K + 1:2 * K + 2, :]

    # InnerProduct.forward: moments of sum_k A_k * B_k (independent Gaussians).
    # Sublane reduction over K — stays on VPU/XLU, MXU intentionally unused.
    ip_m = jnp.sum(ma * mb, axis=0, keepdims=True)                      # (1, T)
    ip_v = jnp.sum(va * vb + va * (mb * mb) + vb * (ma * ma),
                   axis=0, keepdims=True)                               # (1, T)

    # Sum.forward: logits = inner_product + heterogeneity[0] + heterogeneity[1]
    lg_m = ip_m + hma + hmb
    lg_v = ip_v + hva + hvb

    # Logistic.observed.forward: E[sigmoid(logit)] under N(lg_m, lg_v),
    # probit/MacKay moment match; probability of the observed link value.
    kappa = jax.lax.rsqrt(1.0 + (math.pi ** 2 / 8.0) * lg_v)
    p1 = jax.nn.sigmoid(lg_m * kappa)
    links = links_ref[...].astype(jnp.float32)
    proba = links * p1 + (1.0 - links) * (1.0 - p1)

    # Packed (5, T) output: lane-dense rows, single output DMA per step.
    out_ref[0:1, :] = ip_m
    out_ref[1:2, :] = ip_v
    out_ref[2:3, :] = lg_m
    out_ref[3:4, :] = lg_v
    out_ref[4:5, :] = proba


def adjacency_forward(pos_mean, pos_var, het_mean, het_var, idx0, idx1, links):
    """AdjacencyModel forward pass. Returns
    (inner_product mean/var, logits mean/var, observed-link probability),
    each of shape (n_edges, 1) float32."""
    n = idx0.shape[0]
    K = pos_mean.shape[1]
    R = 2 * K + 2

    # Packed, transposed node table: (2K+2, N_nodes).
    # (Node tables may be supplied in bf16 on v6e/v7x — the kernel upcasts.)
    table = jnp.concatenate(
        [pos_mean.T, pos_var.T, het_mean.T, het_var.T], axis=0)

    # --- Select.forward (row gather), plain-JAX glue: 2 lane gathers --------
    A = jnp.take(table, idx0, axis=1)                       # (2K+2, n)
    B = jnp.take(table, idx1, axis=1)                       # (2K+2, n)
    links_row = links.reshape(1, n).astype(jnp.float32)     # (1, n)

    tile = _pick_tile(n)
    n_pad = _round_up(n, tile)
    pad = n_pad - n
    if pad:
        # Padded edge columns are zeros -> lg_v=0, sigmoid(0)=0.5: finite,
        # harmless, sliced off below.
        A = jnp.pad(A, ((0, 0), (0, pad)))
        B = jnp.pad(B, ((0, 0), (0, pad)))
        links_row = jnp.pad(links_row, ((0, 0), (0, pad)))

    spec_ab = pl.BlockSpec((R, tile), lambda i: (0, i))
    spec_lk = pl.BlockSpec((1, tile), lambda i: (0, i))
    spec_out = pl.BlockSpec((5, tile), lambda i: (0, i))

    out = pl.pallas_call(
        functools.partial(_adjacency_kernel, K=K),
        out_shape=jax.ShapeDtypeStruct((5, n_pad), jnp.float32),
        grid_spec=pltpu.PrefetchScalarGridSpec(
            num_scalar_prefetch=0,
            grid=(n_pad // tile,),
            in_specs=[spec_ab, spec_ab, spec_lk],
            out_specs=spec_out,
        ),
        compiler_params=pltpu.CompilerParams(
            dimension_semantics=("parallel",)),
    )(A, B, links_row)

    out = out[:, :n]
    ip_m = out[0].reshape(n, 1)
    ip_v = out[1].reshape(n, 1)
    lg_m = out[2].reshape(n, 1)
    lg_v = out[3].reshape(n, 1)
    proba = out[4].reshape(n, 1)
    return ip_m, ip_v, lg_m, lg_v, proba


def _reference(pos_mean, pos_var, het_mean, het_var, idx0, idx1, links):
    ma, va = pos_mean[idx0], pos_var[idx0]
    mb, vb = pos_mean[idx1], pos_var[idx1]
    ip_m = jnp.sum(ma * mb, -1, keepdims=True)
    ip_v = jnp.sum(va * vb + va * mb ** 2 + vb * ma ** 2, -1, keepdims=True)
    lg_m = ip_m + het_mean[idx0] + het_mean[idx1]
    lg_v = ip_v + het_var[idx0] + het_var[idx1]
    p1 = jax.nn.sigmoid(lg_m / jnp.sqrt(1.0 + (math.pi ** 2 / 8.0) * lg_v))
    l = links.reshape(-1, 1).astype(jnp.float32)
    return ip_m, ip_v, lg_m, lg_v, l * p1 + (1 - l) * (1 - p1)


if __name__ == "__main__":
    key = jax.random.PRNGKey(0)
    N_nodes, K, n_edges = 32, 8, 256

    k1, k2, k3, k4, k5, k6 = jax.random.split(key, 6)
    # Deterministic synthetic "variational state" (module's Gaussian moments).
    pos_mean = 0.5 * jax.random.normal(k1, (N_nodes, K), jnp.float32)
    pos_var = 0.1 + 0.05 * jax.random.uniform(k2, (N_nodes, K), jnp.float32)
    het_mean = 0.3 * jax.random.normal(k3, (N_nodes, 1), jnp.float32)
    het_var = 0.05 + 0.05 * jax.random.uniform(k4, (N_nodes, 1), jnp.float32)
    idx0 = jax.random.randint(k5, (n_edges,), 0, N_nodes, jnp.int32)
    idx1 = jax.random.randint(k6, (n_edges,), 0, N_nodes, jnp.int32)
    links = (jax.random.uniform(jax.random.fold_in(key, 7), (n_edges,)) > 0.5
             ).astype(jnp.float32)

    # Sanity gates mirroring the module's RuntimeError checks (host-side;
    # data-dependent Python raises have no in-kernel equivalent).
    assert float(jnp.max(jnp.abs(pos_mean))) <= 10.0
    assert float(jnp.max(jnp.abs(het_mean))) <= 10.0

    outs = adjacency_forward(pos_mean, pos_var, het_mean, het_var,
                             idx0, idx1, links)
    outs = jax.block_until_ready(outs)

    refs = _reference(pos_mean, pos_var, het_mean, het_var, idx0, idx1, links)
    for o, r in zip(outs, refs):
        assert o.shape == (n_edges, 1)
        assert jnp.allclose(o, r, atol=1e-5, rtol=1e-5), (o, r)

    # Post-hoc versions of forward()'s _inner_products / _logits magnitude gates.
    assert float(jnp.max(jnp.abs(outs[0]))) <= 100.0
    assert float(jnp.max(jnp.abs(outs[2]))) <= 100.0

    print("KERNEL_OK")
</pallas_src>

<mosaic_0001>
module attributes {stable_mosaic.version = 11 : i64} {
  func.func @_adjacency_kernel(%arg0: i32, %arg1: memref<18x256xf32, #tpu.memory_space<vmem>>, %arg2: memref<18x256xf32, #tpu.memory_space<vmem>>, %arg3: memref<1x256xf32, #tpu.memory_space<vmem>>, %arg4: memref<5x256xf32, #tpu.memory_space<vmem>>) attributes {dimension_semantics = [#tpu.dimension_semantics<parallel>], iteration_bounds = array<i64: 1>, scalar_prefetch = 0 : i64, scratch_operands = 0 : i64, tpu.core_type = #tpu.core_type<tc>, window_params = [{transform_indices = @transform_0, window_bounds = array<i64: 18, 256>}, {transform_indices = @transform_1, window_bounds = array<i64: 18, 256>}, {transform_indices = @transform_2, window_bounds = array<i64: 1, 256>}, {transform_indices = @transform_3, window_bounds = array<i64: 5, 256>}]} {
    %c0 = arith.constant 0 : index
    %c0_0 = arith.constant 0 : index
    %0 = vector.load %arg1[%c0, %c0_0] : memref<18x256xf32, #tpu.memory_space<vmem>>, vector<18x256xf32>
    %c0_1 = arith.constant 0 : index
    %c0_2 = arith.constant 0 : index
    %1 = vector.load %arg2[%c0_1, %c0_2] : memref<18x256xf32, #tpu.memory_space<vmem>>, vector<18x256xf32>
    %2 = vector.extract_strided_slice %0 {offsets = [0, 0], sizes = [8, 256], strides = [1, 1]} : vector<18x256xf32> to vector<8x256xf32>
    %3 = vector.extract_strided_slice %0 {offsets = [8, 0], sizes = [8, 256], strides = [1, 1]} : vector<18x256xf32> to vector<8x256xf32>
    %4 = vector.extract_strided_slice %1 {offsets = [0, 0], sizes = [8, 256], strides = [1, 1]} : vector<18x256xf32> to vector<8x256xf32>
    %5 = vector.extract_strided_slice %1 {offsets = [8, 0], sizes = [8, 256], strides = [1, 1]} : vector<18x256xf32> to vector<8x256xf32>
    %6 = vector.extract_strided_slice %0 {offsets = [16, 0], sizes = [1, 256], strides = [1, 1]} : vector<18x256xf32> to vector<1x256xf32>
    %7 = vector.extract_strided_slice %0 {offsets = [17, 0], sizes = [1, 256], strides = [1, 1]} : vector<18x256xf32> to vector<1x256xf32>
    %8 = vector.extract_strided_slice %1 {offsets = [16, 0], sizes = [1, 256], strides = [1, 1]} : vector<18x256xf32> to vector<1x256xf32>
    %9 = vector.extract_strided_slice %1 {offsets = [17, 0], sizes = [1, 256], strides = [1, 1]} : vector<18x256xf32> to vector<1x256xf32>
    %10 = arith.mulf %2, %4 : vector<8x256xf32>
    %cst = arith.constant dense<0.000000e+00> : vector<256xf32>
    %11 = vector.multi_reduction <add>, %10, %cst [0] : vector<8x256xf32> to vector<256xf32>
    %12 = vector.shape_cast %11 : vector<256xf32> to vector<1x256xf32>
    %13 = arith.mulf %3, %5 : vector<8x256xf32>
    %14 = arith.mulf %4, %4 : vector<8x256xf32>
    %15 = arith.mulf %3, %14 : vector<8x256xf32>
    %16 = arith.addf %13, %15 : vector<8x256xf32>
    %17 = arith.mulf %2, %2 : vector<8x256xf32>
    %18 = arith.mulf %5, %17 : vector<8x256xf32>
    %19 = arith.addf %16, %18 : vector<8x256xf32>
    %cst_3 = arith.constant dense<0.000000e+00> : vector<256xf32>
    %20 = vector.multi_reduction <add>, %19, %cst_3 [0] : vector<8x256xf32> to vector<256xf32>
    %21 = vector.shape_cast %20 : vector<256xf32> to vector<1x256xf32>
    %22 = arith.addf %12, %6 : vector<1x256xf32>
    %23 = arith.addf %22, %8 : vector<1x256xf32>
    %24 = arith.addf %21, %7 : vector<1x256xf32>
    %25 = arith.addf %24, %9 : vector<1x256xf32>
    %cst_4 = arith.constant 1.23370051 : f32
    %26 = vector.broadcast %cst_4 : f32 to vector<1x256xf32>
    %27 = arith.mulf %26, %25 : vector<1x256xf32>
    %cst_5 = arith.constant 1.000000e+00 : f32
    %28 = vector.broadcast %cst_5 : f32 to vector<1x256xf32>
    %29 = arith.addf %28, %27 : vector<1x256xf32>
    %30 = math.rsqrt %29 : vector<1x256xf32>
    %31 = arith.mulf %23, %30 : vector<1x256xf32>
    %32 = arith.negf %31 : vector<1x256xf32>
    %33 = math.exp %32 : vector<1x256xf32>
    %cst_6 = arith.constant 1.000000e+00 : f32
    %34 = vector.broadcast %cst_6 : f32 to vector<1x256xf32>
    %35 = arith.addf %34, %33 : vector<1x256xf32>
    %36 = arith.divf %34, %35 : vector<1x256xf32>
    %c0_7 = arith.constant 0 : index
    %c0_8 = arith.constant 0 : index
    %37 = vector.load %arg3[%c0_7, %c0_8] : memref<1x256xf32, #tpu.memory_space<vmem>>, vector<1x256xf32>
    %38 = arith.mulf %37, %36 : vector<1x256xf32>
    %cst_9 = arith.constant 1.000000e+00 : f32
    %39 = vector.broadcast %cst_9 : f32 to vector<1x256xf32>
    %40 = arith.subf %39, %37 : vector<1x256xf32>
    %cst_10 = arith.constant 1.000000e+00 : f32
    %41 = vector.broadcast %cst_10 : f32 to vector<1x256xf32>
    %42 = arith.subf %41, %36 : vector<1x256xf32>
    %43 = arith.mulf %40, %42 : vector<1x256xf32>
    %44 = arith.addf %38, %43 : vector<1x256xf32>
    %c0_11 = arith.constant 0 : index
    %c0_12 = arith.constant 0 : index
    %45 = vector.load %arg4[%c0_11, %c0_12] : memref<5x256xf32, #tpu.memory_space<vmem>>, vector<1x256xf32>
    tpu.vector_store %arg4[%c0_11, %c0_12], %12 {strides = array<i32>} : memref<5x256xf32, #tpu.memory_space<vmem>>, vector<1x256xf32>,
    %c1 = arith.constant 1 : index
    %c0_13 = arith.constant 0 : index
    %46 = vector.load %arg4[%c1, %c0_13] : memref<5x256xf32, #tpu.memory_space<vmem>>, vector<1x256xf32>
    tpu.vector_store %arg4[%c1, %c0_13], %21 {strides = array<i32>} : memref<5x256xf32, #tpu.memory_space<vmem>>, vector<1x256xf32>,
    %c2 = arith.constant 2 : index
    %c0_14 = arith.constant 0 : index
    %47 = vector.load %arg4[%c2, %c0_14] : memref<5x256xf32, #tpu.memory_space<vmem>>, vector<1x256xf32>
    tpu.vector_store %arg4[%c2, %c0_14], %23 {strides = array<i32>} : memref<5x256xf32, #tpu.memory_space<vmem>>, vector<1x256xf32>,
    %c3 = arith.constant 3 : index
    %c0_15 = arith.constant 0 : index
    %48 = vector.load %arg4[%c3, %c0_15] : memref<5x256xf32, #tpu.memory_space<vmem>>, vector<1x256xf32>
    tpu.vector_store %arg4[%c3, %c0_15], %25 {strides = array<i32>} : memref<5x256xf32, #tpu.memory_space<vmem>>, vector<1x256xf32>,
    %c4 = arith.constant 4 : index
    %c0_16 = arith.constant 0 : index
    %49 = vector.load %arg4[%c4, %c0_16] : memref<5x256xf32, #tpu.memory_space<vmem>>, vector<1x256xf32>
    tpu.vector_store %arg4[%c4, %c0_16], %44 {strides = array<i32>} : memref<5x256xf32, #tpu.memory_space<vmem>>, vector<1x256xf32>,
    return
  }
  func.func @transform_0(%arg0: i32) -> (i32, i32) {
    %c0_i32 = arith.constant 0 : i32
    %c0_i32_0 = arith.constant 0 : i32
    return %c0_i32, %arg0 : i32, i32
  }
  func.func @transform_1(%arg0: i32) -> (i32, i32) {
    %c0_i32 = arith.constant 0 : i32
    %c0_i32_0 = arith.constant 0 : i32
    return %c0_i32, %arg0 : i32, i32
  }
  func.func @transform_2(%arg0: i32) -> (i32, i32) {
    %c0_i32 = arith.constant 0 : i32
    %c0_i32_0 = arith.constant 0 : i32
    return %c0_i32, %arg0 : i32, i32
  }
  func.func @transform_3(%arg0: i32) -> (i32, i32) {
    %c0_i32 = arith.constant 0 : i32
    %c0_i32_0 = arith.constant 0 : i32
    return %c0_i32, %arg0 : i32, i32
  }
}

</mosaic_0001>

<bundles_post_ra>
// kernel: tpu_custom_call.1
= control target key start
LH: loop header
LB: loop body
LE: loop exit
PB: predicated region body
PF: predicated region fallthrough
CT: control target
= control target key end

     0   :  { %8 = vsyncpa [#allocation3], 0  ;;  %s464_s0 = inlined_call_operand.hbm [shape: f32[18,256], index: 0, kind: input, shape index: {}]   ;;  %s465_s1 = inlined_call_operand.hbm [shape: f32[18,256], index: 1, kind: input, shape index: {}]   ;;  %s466_s2 = inlined_call_operand.vmem [shape: f32[1,256], index: 2, kind: input, shape index: {}]   ;;  %s467_s3 = inlined_call_operand.hbm [shape: f32[5,256], index: 3, kind: output, shape index: {}]  }
   0x1   :  { %9 = vsyncpa [#allocation6], 0 }
   0x2   :  { %10 = vsyncpa [#allocation4], 0  ;;  %s371_s12 = smov [#allocation2]   ;;  %s299_s16 = scalar_lea.hbm %s464_s0, 768 }
   0x3   :  { %s16_s13 = sshll.u32 %s371_s12, 4  ;;  %p300_p0 = scmp.ne.s32.totalorder %s464_s0, %s299_s16  ;;  %s17_s13 = int_to_ptr.vmem [resolvable:$true] %s16_s13 }
   0x4   :  { %p303_p1 = scmp.lt.u32.totalorder %s299_s16, %s464_s0 }
   0x6   :  { %p305_p2 = pnand %p303_p1, %p300_p0 }
   0x8   :  { %308 = shalt.err (!%p305_p2)
}
   0x9   :  { %s309_s21 = scalar_lea.vmem %s17_s13, 768  ;;  %p314_p4 = scmp.lt.s32.totalorder %s17_s13, %s17_s13 }
   0xa   :  { %p310_p3 = scmp.ne.s32.totalorder %s17_s13, %s309_s21  ;;  %p315_p5 = scmp.lt.s32.totalorder %s309_s21, %s309_s21 }
   0xc   :  { %p316_p6 = por %p315_p5, %p314_p4 }
   0xe   :  { %p317_p7 = pnand %p316_p6, %p310_p3 }
  0x10   :  { %320 = shalt.err (!%p317_p7)
}
  0x11   :  { %s372_s22 = smov 256   ;;  %s373_s23 = smov 16  }
  0x12   :  { %22 = dma.hbm_to_vmem [thread:$0]  %s464_s0, 768, %s17_s13, [#allocation3], %s372_s22, %s372_s22, %s373_s23  }
  0x13   :  { %s374_s26 = smov [#allocation5]   ;;  %s321_s30 = scalar_lea.hbm %s465_s1, 768 }
  0x14   :  { %s28_s27 = sshll.u32 %s374_s26, 4  ;;  %p322_p8 = scmp.ne.s32.totalorder %s465_s1, %s321_s30  ;;  %s29_s27 = int_to_ptr.vmem [resolvable:$true] %s28_s27 }
  0x15   :  { %p325_p9 = scmp.lt.u32.totalorder %s321_s30, %s465_s1 }
  0x17   :  { %p327_p10 = pnand %p325_p9, %p322_p8 }
  0x19   :  { %330 = shalt.err (!%p327_p10)
}
  0x1a   :  { %s331_s8 = scalar_lea.vmem %s29_s27, 768  ;;  %p336_p12 = scmp.lt.s32.totalorder %s29_s27, %s29_s27 }
  0x1b   :  { %p332_p11 = scmp.ne.s32.totalorder %s29_s27, %s331_s8  ;;  %p337_p13 = scmp.lt.s32.totalorder %s331_s8, %s331_s8 }
  0x1d   :  { %p338_p0 = por %p337_p13, %p336_p12 }
  0x1f   :  { %p339_p1 = pnand %p338_p0, %p332_p11 }
  0x21   :  { %342 = shalt.err (!%p339_p1)
}
  0x22   :  { %34 = dma.hbm_to_vmem [thread:$0]  %s465_s1, 768, %s29_s27, [#allocation6], %s372_s22, %s372_s22, %s373_s23  }
  0x23   :  { %365 = dma.done.wait [#allocation3], 768  }
  0x24   :  { %366 = vsyncadd [#allocation3], 4294966528 }
  0x25   :  { %367 = dma.done.wait [#allocation6], 768  }
  0x26   :  { %368 = vsyncadd [#allocation6], 4294966528  ;;  %v43_v0 = vld [vmem:[#allocation2] sm:$0xff]  ;;  %v44_v1 = vld [vmem:[#allocation2 + $0x8] sm:$0xff]  ;;  %v375_v29 = vmov 1966171168   ;;  %v136_v31 = vlaneseq }
  0x27   :  { %v49_v2 = vld [vmem:[#allocation5] sm:$0xff]  ;;  %v50_v3 = vld [vmem:[#allocation5 + $0x8] sm:$0xff]  ;;  %v77_v6 = vmul.f32 %v43_v0, %v43_v0  ;;  %v78_v7 = vmul.f32 %v44_v1, %v44_v1  ;;  %v51_v12 = vld [vmem:[#allocation5 + $0x10] sm:$0xff]  ;;  %v134_v30 = vunpack.c.l.s4 %v375_v29  ;;  %s376_s11 = smov [#allocation7]  }
  0x28   :  { %v55_v4 = vmul.f32 %v49_v2, %v43_v0  ;;  %v71_v5 = vmul.f32 %v49_v2, %v49_v2  ;;  %v45_v8 = vld [vmem:[#allocation2 + $0x10] sm:$0xff]  ;;  %v46_v9 = vld [vmem:[#allocation2 + $0x18] sm:$0xff]  ;;  %v56_v10 = vmul.f32 %v50_v3, %v44_v1  ;;  %v72_v11 = vmul.f32 %v50_v3, %v50_v3  ;;  %v52_v14 = vld [vmem:[#allocation5 + $0x18] sm:$0xff]  ;;  %s269_s12 = sshll.u32 %s376_s11, 4  ;;  %s270_s12 = int_to_ptr.vmem [resolvable:$true] %s269_s12 }
  0x29   :  { %v69_v15 = vmul.f32 %v51_v12, %v45_v8  ;;  %v79_v17 = vmul.f32 %v77_v6, %v51_v12  ;;  %v70_v19 = vmul.f32 %v52_v14, %v46_v9  ;;  %v80_v21 = vmul.f32 %v78_v7, %v52_v14  ;;  %v47_v46 = vld [vmem:[#allocation2 + $0x20] sm:$0x3]  ;;  %v48_v48 = vld [vmem:[#allocation2 + $0x28] sm:$0x3]  ;;  %v53_v56 = vld [vmem:[#allocation5 + $0x20] sm:$0x3]  ;;  %p348_p3 = scmp.lt.s32.totalorder %s270_s12, %s270_s12 }
  0x2a   :  { %v57_v13 = vrot.slane %v55_v4, 4  ;;  %v73_v16 = vmul.f32 %v71_v5, %v45_v8  ;;  %v63_v18 = vrot.slane %v56_v10, 4  ;;  %v74_v20 = vmul.f32 %v72_v11, %v46_v9  ;;  %v54_v57 = vld [vmem:[#allocation5 + $0x28] sm:$0x3] }
  0x2b   :  { %v135_v40 = vunpack.c.0.s8 %v134_v30  ;;  %v137_v41 = vshrl.u32 %v136_v31, 7  ;;  %vm424_vm0 = vcmp.lt.s32.totalorder %v136_v31, 256 }
  0x2c   :  { %v58_v22 = vadd.f32 %v57_v13, %v55_v4  ;;  %v75_v23 = vadd.f32 %v73_v16, %v69_v15  ;;  %v64_v24 = vadd.f32 %v63_v18, %v56_v10  ;;  %v76_v25 = vadd.f32 %v74_v20, %v70_v19 }
  0x2d   :  { %v421_v51 = vsub.s32 %v135_v40, %v137_v41 }
  0x2e   :  { %v59_v26 = vrot.slane %v58_v22, 2  ;;  %v81_v27 = vadd.f32 %v79_v17, %v75_v23  ;;  %v65_v28 = vrot.slane %v64_v24, 2  ;;  %v82_v32 = vadd.f32 %v80_v21, %v76_v25 }
  0x30   :  { %v60_v33 = vadd.f32 %v59_v26, %v58_v22  ;;  %v83_v34 = vrot.slane %v81_v27, 4  ;;  %v66_v35 = vadd.f32 %v65_v28, %v64_v24  ;;  %v89_v36 = vrot.slane %v82_v32, 4 }
  0x32   :  { %v61_v37 = vrot.slane %v60_v33, 1  ;;  %v84_v38 = vadd.f32 %v83_v34, %v81_v27  ;;  %v67_v39 = vrot.slane %v66_v35, 1  ;;  %v90_v42 = vadd.f32 %v89_v36, %v82_v32 }
  0x34   :  { %v62_v43 = vadd.f32 %v61_v37, %v60_v33  ;;  %v85_v44 = vrot.slane %v84_v38, 2  ;;  %v68_v45 = vadd.f32 %v67_v39, %v66_v35  ;;  %v91_v47 = vrot.slane %v90_v42, 2  ;;  %v129_v37 = vld [vmem:[%s466_s2] sm:$0x3]  ;;  %s343_s2 = scalar_lea.vmem %s270_s12, 256 }
  0x35   :  { %v149_v41 = vsub.f32 1.0, %v129_v37  ;;  %p344_p2 = scmp.ne.s32.totalorder %s270_s12, %s343_s2  ;;  %p349_p4 = scmp.lt.s32.totalorder %s343_s2, %s343_s2 }
  0x36   :  { %v86_v49 = vadd.f32 %v85_v44, %v84_v38  ;;  %v95_v50 = vadd.f32 %v62_v43, %v47_v46  ;;  %v174_v52 = vcombine.low %v62_v43, %v68_v45  ;;  %v92_v53 = vadd.f32 %v91_v47, %v90_v42 }
  0x37   :  { %v96_v54 = vadd.f32 %v68_v45, %v48_v48  ;;  %p350_p5 = por %p349_p4, %p348_p3 }
  0x38   :  { %v87_v55 = vrot.slane %v86_v49, 1  ;;  %v181_v58 = vrot.slane %v174_v52, %v421_v51  ;;  %v93_v59 = vrot.slane %v92_v53, 1  ;;  %v97_v60 = vadd.f32 %v95_v50, %v53_v56 }
  0x39   :  { %v98_v61 = vadd.f32 %v96_v54, %v54_v57  ;;  %p351_p6 = pnand %p350_p5, %p344_p2 }
  0x3a   :  { %v88_v63 = vadd.f32 %v87_v55, %v86_v49  ;;  %v188_v0 = vrot.slane %v181_v58, %v421_v51  ;;  %v94_v1 = vadd.f32 %v93_v59, %v92_v53 }
  0x3b   :  { %v219_v2 = vcombine.low %v97_v60, %v98_v61 }
  0x3c   :  { %v99_v3 = vadd.f32 %v88_v63, %v47_v46  ;;  %194 = vst.msk [vmem:[#allocation7] ss:$8 sm:$0x3] %vm424_vm0, %v188_v0  ;;  %v100_v4 = vadd.f32 %v94_v1, %v48_v48  ;;  %v198_v5 = vcombine.low %v88_v63, %v94_v1 }
  0x3d   :  { %v226_v6 = vrot.slane %v219_v2, %v421_v51 }
  0x3e   :  { %v101_v7 = vadd.f32 %v99_v3, %v53_v56  ;;  %v205_v8 = vrot.slane %v198_v5, %v421_v51  ;;  %v102_v10 = vadd.f32 %v100_v4, %v54_v57 }
  0x3f   :  { %v233_v9 = vrot.slane %v226_v6, %v421_v51 }
  0x40   :  { %v103_v11 = vmul.f32 1.2337005, %v101_v7  ;;  %v212_v12 = vrot.slane %v205_v8, %v421_v51  ;;  %v104_v13 = vmul.f32 1.2337005, %v102_v10  ;;  %v240_v14 = vcombine.low %v101_v7, %v102_v10 }
  0x41   :  { %236 = vst.msk [vmem:[#allocation7 + $0x2] ss:$8 sm:$0x3] %vm424_vm0, %v233_v9 }
  0x42   :  { %v105_v15 = vadd.f32 1.0, %v103_v11  ;;  %215 = vst.msk [vmem:[#allocation7 + $0x1] ss:$8 sm:$0x3] %vm424_vm0, %v212_v12  ;;  %v106_v16 = vadd.f32 1.0, %v104_v13  ;;  %v247_v17 = vrot.slane %v240_v14, %v421_v51 }
  0x44   :  { %287 = vrsqrt.f32 %v105_v15  ;;  %v248_v18 = vcombine.high %v247_v17, %v247_v17 }
  0x45   :  { %289 = vrsqrt.f32 %v106_v16 }
  0x46   :  { %v255_v19 = vrot.slane %v248_v18, %v421_v51 }
  0x48   :  { %258 = vst.msk [vmem:[#allocation7 + $0x3] ss:$8 sm:$0x3] %vm424_vm0, %v255_v19 }
  0x4e   :  { %v288_v20 = vpop.eup %287 }
  0x4f   :  { %v290_v21 = vpop.eup %289  ;;  %v111_v22 = vrot.slane %v288_v20, 1 }
  0x50   :  { %v112_v23 = vrot.slane %v290_v21, 1 }
  0x51   :  { %v115_v24 = vmul.f32 %v111_v22, %v97_v60 }
  0x52   :  { %v116_v25 = vmul.f32 %v112_v23, %v98_v61 }
  0x53   :  { %v279_v26 = vmul.f32 -1.442695, %v115_v24 }
  0x54   :  { %v280_v27 = vmul.f32 -1.442695, %v116_v25 }
  0x55   :  { %291 = vpow2.f32 %v279_v26 }
  0x56   :  { %293 = vpow2.f32 %v280_v27 }
  0x5f   :  { %v292_v28 = vpop.eup %291 }
  0x60   :  { %v294_v29 = vpop.eup %293  ;;  %v123_v30 = vadd.f32 1.0, %v292_v28 }
  0x61   :  { %v124_v31 = vadd.f32 1.0, %v294_v29 }
  0x62   :  { %295 = vrcp.f32 %v123_v30 }
  0x63   :  { %297 = vrcp.f32 %v124_v31 }
  0x6c   :  { %v296_v32 = vpop.eup %295 }
  0x6d   :  { %v298_v33 = vpop.eup %297  ;;  %v150_v34 = vsub.f32 1.0, %v296_v32 }
  0x6e   :  { %v132_v35 = vcombine.low %v296_v32, %v298_v33  ;;  %v151_v36 = vsub.f32 1.0, %v298_v33 }
  0x70   :  { %v139_v38 = vrot.slane %v132_v35, %v421_v51  ;;  %v154_v39 = vcombine.low %v150_v34, %v151_v36 }
  0x72   :  { %v146_v40 = vrot.slane %v139_v38, %v421_v51  ;;  %v161_v42 = vrot.slane %v154_v39, %v421_v51 }
  0x74   :  { %v148_v43 = vmul.f32 %v146_v40, %v129_v37  ;;  %v168_v44 = vrot.slane %v161_v42, %v421_v51 }
  0x76   :  { %v170_v45 = vmul.f32 %v168_v44, %v149_v41 }
  0x78   :  { %v171_v46 = vadd.f32 %v170_v45, %v148_v43 }
  0x7a   :  { %261 = vst.msk [vmem:[#allocation7 + $0x4] ss:$8 sm:$0x3] %vm424_vm0, %v171_v46 }
  0x7b   :  { %354 = shalt.err (!%p351_p6)
}
  0x7c   :  { %s355_s15 = scalar_lea.hbm %s467_s3, 256 }
  0x7d   :  { %p356_p7 = scmp.ne.s32.totalorder %s467_s3, %s355_s15  ;;  %p359_p8 = scmp.lt.u32.totalorder %s355_s15, %s467_s3 }
  0x7f   :  { %p361_p9 = pnand %p359_p8, %p356_p7 }
  0x81   :  { %364 = shalt.err (!%p361_p9)
}
  0x82   :  { %272 = dma.vmem_to_hbm [thread:$0]  %s270_s12, 256, %s467_s3, [#allocation4]  }
  0x83   :  { %369 = dma.done.wait [#allocation4], 256  }
  0x84   :  { %370 = vsyncadd [#allocation4], 4294967040 }
  0x85   :  { %276 = vsyncpa [#allocation3], 1 }
  0x86   :  { %277 = vsyncpa [#allocation6], 1 }
  0x87   :  { %278 = vsyncpa [#allocation4], 1 }

</bundles_post_ra>
